<compile_context>
chip_gen: v7x
topology: tpu7x:2x2x1
jax: 0.10.0
libtpu: 0.0.40
codegen_flags: <defaults>
</compile_context>

<pallas_src>
import functools

import jax
import jax.numpy as jnp
from jax.experimental import pallas as pl
from jax.experimental.pallas import tpu as pltpu

BN_EPS = 1e-5


def _bn_train(h, gamma, beta):
    """BatchNorm1d, training mode, single-pass stats: var = E[h^2] - E[h]^2 (biased)."""
    m = jnp.mean(h, axis=0, keepdims=True)
    msq = jnp.mean(h * h, axis=0, keepdims=True)
    var = jnp.maximum(msq - m * m, 0.0)
    return (h - m) * jax.lax.rsqrt(var + BN_EPS) * gamma + beta


def mu_kernel(z_ref, w0_ref, w1_ref, w2_ref, vec_ref, out_ref, *, apply_bn):
    compute_dtype = w0_ref.dtype
    d0 = w0_ref.shape[1]
    d1 = w1_ref.shape[1]
    d2 = w2_ref.shape[1]

    # Single load of all small per-layer vectors (one packed (8, D) f32 tile).
    vecs = vec_ref[...]
    b0, g0, be0 = vecs[0:1, :d0], vecs[1:2, :d0], vecs[2:3, :d0]
    b1, g1, be1 = vecs[3:4, :d1], vecs[4:5, :d1], vecs[5:6, :d1]
    b2 = vecs[6:7, :d2]

    z = z_ref[...]

    # Layer 0: Linear -> ReLU -> BN (bias/BN always in f32; MXU accumulates in f32)
    h = jnp.dot(z, w0_ref[...], preferred_element_type=jnp.float32) + b0
    h = jnp.maximum(h, 0.0)
    if apply_bn:
        h = _bn_train(h, g0, be0)

    # Layer 1: Linear -> ReLU -> BN
    h = jnp.dot(h.astype(compute_dtype), w1_ref[...],
                preferred_element_type=jnp.float32) + b1
    h = jnp.maximum(h, 0.0)
    if apply_bn:
        h = _bn_train(h, g1, be1)

    # Layer 2 (final): Linear -> ReLU (no BN, matching the PyTorch forward)
    h = jnp.dot(h.astype(compute_dtype), w2_ref[...],
                preferred_element_type=jnp.float32) + b2
    out_ref[...] = jnp.maximum(h, 0.0)


@functools.partial(jax.jit, static_argnames=("compute_dtype",))
def mu_forward(z, params, *, compute_dtype=jnp.float32):
    """Fused Mu forward in a single Pallas call (all operands VMEM-resident).

    Activations are B x 256 f32 (1 KiB/row), so a single block scales to very large B
    before any grid/tiling would be needed.
    """
    B, z_dim = z.shape
    w0, w1, w2, vecs = params
    d0, d1, d2 = w0.shape[1], w1.shape[1], w2.shape[1]
    apply_bn = B > 1  # mirrors `if z.size(0) > 1` in the PyTorch forward

    # Cast matmul operands once outside the kernel (halves weight DMA bytes for bf16).
    z_c = z.astype(compute_dtype)
    w0_c = w0.astype(compute_dtype)
    w1_c = w1.astype(compute_dtype)
    w2_c = w2.astype(compute_dtype)

    flops = 2 * B * (z_dim * d0 + d0 * d1 + d1 * d2)
    bytes_accessed = (
        z_c.size * z_c.dtype.itemsize
        + w0_c.size * w0_c.dtype.itemsize
        + w1_c.size * w1_c.dtype.itemsize
        + w2_c.size * w2_c.dtype.itemsize
        + vecs.size * vecs.dtype.itemsize
        + B * d2 * 4
    )

    vmem_spec = pl.BlockSpec(memory_space=pltpu.MemorySpace.VMEM)
    kernel = functools.partial(mu_kernel, apply_bn=apply_bn)

    return pl.pallas_call(
        kernel,
        out_shape=jax.ShapeDtypeStruct((B, d2), jnp.float32),
        in_specs=[vmem_spec] * 5,
        out_specs=vmem_spec,
        compiler_params=pltpu.CompilerParams(vmem_limit_bytes=32 * 1024 * 1024),
        cost_estimate=pl.CostEstimate(
            flops=flops, transcendentals=0, bytes_accessed=bytes_accessed),
    )(z_c, w0_c, w1_c, w2_c, vecs)


def init_params(key, z_dim, network_dims=(256, 256, 256)):
    """Deterministic synthetic init (PyTorch-like uniform ranges).

    Returns (w0, w1, w2, vecs) where weights are pre-transposed (in, out) f32 and
    `vecs` is an (8, max_dim) f32 pack of [b0, g0, be0, b1, g1, be1, b2, zeros].
    """
    d0, d1, d2 = network_dims
    dims = [z_dim, d0, d1, d2]
    keys = jax.random.split(key, 6)
    ws, bs = [], []
    for i in range(3):
        fan_in, fan_out = dims[i], dims[i + 1]
        bound = 1.0 / (fan_in ** 0.5)
        ws.append(jax.random.uniform(keys[2 * i], (fan_in, fan_out),
                                     jnp.float32, -bound, bound))
        bs.append(jax.random.uniform(keys[2 * i + 1], (fan_out,),
                                     jnp.float32, -bound, bound))

    dmax = max(network_dims)

    def pad(v):
        return jnp.pad(v, (0, dmax - v.shape[0]))

    rows = [
        pad(bs[0]), pad(jnp.ones((d0,), jnp.float32)), pad(jnp.zeros((d0,), jnp.float32)),
        pad(bs[1]), pad(jnp.ones((d1,), jnp.float32)), pad(jnp.zeros((d1,), jnp.float32)),
        pad(bs[2]), jnp.zeros((dmax,), jnp.float32),
    ]
    vecs = jnp.stack(rows, axis=0)  # (8, dmax)
    return ws[0], ws[1], ws[2], vecs


def mu_reference(z, params):
    """Plain-JAX reference for correctness checking (matches the PyTorch forward)."""
    w0, w1, w2, vecs = params
    d0, d1, d2 = w0.shape[1], w1.shape[1], w2.shape[1]
    b0, g0, be0 = vecs[0, :d0], vecs[1, :d0], vecs[2, :d0]
    b1, g1, be1 = vecs[3, :d1], vecs[4, :d1], vecs[5, :d1]
    b2 = vecs[6, :d2]
    apply_bn = z.shape[0] > 1

    def bn(h, g, be):
        m = jnp.mean(h, axis=0, keepdims=True)
        v = jnp.mean((h - m) ** 2, axis=0, keepdims=True)
        return (h - m) / jnp.sqrt(v + BN_EPS) * g + be

    h = jnp.maximum(z @ w0 + b0, 0.0)
    if apply_bn:
        h = bn(h, g0, be0)
    h = jnp.maximum(h @ w1 + b1, 0.0)
    if apply_bn:
        h = bn(h, g1, be1)
    return jnp.maximum(h @ w2 + b2, 0.0)


if __name__ == "__main__":
    key = jax.random.PRNGKey(0)
    k_z, k_p = jax.random.split(key)

    B, Z_DIM = 8, 32
    NETWORK_DIMS = (256, 256, 256)

    z = jax.random.normal(k_z, (B, Z_DIM), jnp.float32)
    params = init_params(k_p, Z_DIM, NETWORK_DIMS)
    ref = mu_reference(z, params)

    # f32 path (default, bit-tight)
    out = jax.block_until_ready(mu_forward(z, params))
    assert out.shape == (B, NETWORK_DIMS[-1])
    assert jnp.allclose(out, ref, atol=1e-3, rtol=1e-3), "f32 kernel mismatch vs reference"

    # bf16 matmul path (f32 accumulation) — MXU-native, looser tolerance
    out_bf16 = jax.block_until_ready(mu_forward(z, params, compute_dtype=jnp.bfloat16))
    assert jnp.allclose(out_bf16, ref, atol=0.1, rtol=0.1), "bf16 kernel mismatch vs reference"

    # B == 1 path (BatchNorm skipped, mirroring the PyTorch `if z.size(0) > 1`)
    z1 = z[:1]
    out1 = jax.block_until_ready(mu_forward(z1, params))
    assert jnp.allclose(out1, mu_reference(z1, params), atol=1e-3, rtol=1e-3), \
        "B=1 kernel mismatch vs reference"

    print("KERNEL_OK")
</pallas_src>

<mosaic_0001>
module attributes {stable_mosaic.version = 11 : i64} {
  func.func @mu_kernel(%arg0: memref<8x32xf32, #tpu.memory_space<vmem>>, %arg1: memref<32x256xf32, #tpu.memory_space<vmem>>, %arg2: memref<256x256xf32, #tpu.memory_space<vmem>>, %arg3: memref<256x256xf32, #tpu.memory_space<vmem>>, %arg4: memref<8x256xf32, #tpu.memory_space<vmem>>, %arg5: memref<8x256xf32, #tpu.memory_space<vmem>>) attributes {dimension_semantics = [], scalar_prefetch = 0 : i64, scratch_operands = 0 : i64, tpu.core_type = #tpu.core_type<tc>} {
    %c0 = arith.constant 0 : index
    %c0_0 = arith.constant 0 : index
    %0 = vector.load %arg4[%c0, %c0_0] : memref<8x256xf32, #tpu.memory_space<vmem>>, vector<8x256xf32>
    %1 = vector.extract_strided_slice %0 {offsets = [0, 0], sizes = [1, 256], strides = [1, 1]} : vector<8x256xf32> to vector<1x256xf32>
    %2 = vector.extract_strided_slice %0 {offsets = [1, 0], sizes = [1, 256], strides = [1, 1]} : vector<8x256xf32> to vector<1x256xf32>
    %3 = vector.extract_strided_slice %0 {offsets = [2, 0], sizes = [1, 256], strides = [1, 1]} : vector<8x256xf32> to vector<1x256xf32>
    %4 = vector.extract_strided_slice %0 {offsets = [3, 0], sizes = [1, 256], strides = [1, 1]} : vector<8x256xf32> to vector<1x256xf32>
    %5 = vector.extract_strided_slice %0 {offsets = [4, 0], sizes = [1, 256], strides = [1, 1]} : vector<8x256xf32> to vector<1x256xf32>
    %6 = vector.extract_strided_slice %0 {offsets = [5, 0], sizes = [1, 256], strides = [1, 1]} : vector<8x256xf32> to vector<1x256xf32>
    %7 = vector.extract_strided_slice %0 {offsets = [6, 0], sizes = [1, 256], strides = [1, 1]} : vector<8x256xf32> to vector<1x256xf32>
    %c0_1 = arith.constant 0 : index
    %c0_2 = arith.constant 0 : index
    %8 = vector.load %arg0[%c0_1, %c0_2] : memref<8x32xf32, #tpu.memory_space<vmem>>, vector<8x32xf32>
    %c0_3 = arith.constant 0 : index
    %c0_4 = arith.constant 0 : index
    %9 = vector.load %arg1[%c0_3, %c0_4] : memref<32x256xf32, #tpu.memory_space<vmem>>, vector<32x256xf32>
    %cst = arith.constant dense<0.000000e+00> : vector<8x256xf32>
    %10 = tpu.matmul %8, %9, %cst {dimension_numbers = #tpu.dot_dimension_numbers<[1], [0], [0], [1], [0, 0, 1, 1], [], []>} : vector<8x32xf32>, vector<32x256xf32>, vector<8x256xf32> -> vector<8x256xf32>
    %11 = vector.broadcast %1 : vector<1x256xf32> to vector<8x256xf32>
    %12 = arith.addf %10, %11 : vector<8x256xf32>
    %cst_5 = arith.constant 0.000000e+00 : f32
    %13 = vector.broadcast %cst_5 : f32 to vector<8x256xf32>
    %14 = arith.maximumf %12, %13 : vector<8x256xf32>
    %cst_6 = arith.constant dense<0.000000e+00> : vector<256xf32>
    %15 = vector.multi_reduction <add>, %14, %cst_6 [0] : vector<8x256xf32> to vector<256xf32>
    %16 = vector.shape_cast %15 : vector<256xf32> to vector<1x256xf32>
    %cst_7 = arith.constant 8.000000e+00 : f32
    %17 = vector.broadcast %cst_7 : f32 to vector<1x256xf32>
    %18 = arith.divf %16, %17 : vector<1x256xf32>
    %19 = arith.mulf %14, %14 : vector<8x256xf32>
    %cst_8 = arith.constant dense<0.000000e+00> : vector<256xf32>
    %20 = vector.multi_reduction <add>, %19, %cst_8 [0] : vector<8x256xf32> to vector<256xf32>
    %21 = vector.shape_cast %20 : vector<256xf32> to vector<1x256xf32>
    %cst_9 = arith.constant 8.000000e+00 : f32
    %22 = vector.broadcast %cst_9 : f32 to vector<1x256xf32>
    %23 = arith.divf %21, %22 : vector<1x256xf32>
    %24 = arith.mulf %18, %18 : vector<1x256xf32>
    %25 = arith.subf %23, %24 : vector<1x256xf32>
    %cst_10 = arith.constant 0.000000e+00 : f32
    %26 = vector.broadcast %cst_10 : f32 to vector<1x256xf32>
    %27 = arith.maximumf %25, %26 : vector<1x256xf32>
    %28 = vector.broadcast %18 : vector<1x256xf32> to vector<8x256xf32>
    %29 = arith.subf %14, %28 : vector<8x256xf32>
    %cst_11 = arith.constant 9.99999974E-6 : f32
    %30 = vector.broadcast %cst_11 : f32 to vector<1x256xf32>
    %31 = arith.addf %27, %30 : vector<1x256xf32>
    %32 = math.rsqrt %31 : vector<1x256xf32>
    %33 = vector.broadcast %32 : vector<1x256xf32> to vector<8x256xf32>
    %34 = arith.mulf %29, %33 : vector<8x256xf32>
    %35 = vector.broadcast %2 : vector<1x256xf32> to vector<8x256xf32>
    %36 = arith.mulf %34, %35 : vector<8x256xf32>
    %37 = vector.broadcast %3 : vector<1x256xf32> to vector<8x256xf32>
    %38 = arith.addf %36, %37 : vector<8x256xf32>
    %c0_12 = arith.constant 0 : index
    %c0_13 = arith.constant 0 : index
    %39 = vector.load %arg2[%c0_12, %c0_13] : memref<256x256xf32, #tpu.memory_space<vmem>>, vector<256x256xf32>
    %cst_14 = arith.constant dense<0.000000e+00> : vector<8x256xf32>
    %40 = tpu.matmul %38, %39, %cst_14 {dimension_numbers = #tpu.dot_dimension_numbers<[1], [0], [0], [1], [0, 0, 1, 1], [], []>} : vector<8x256xf32>, vector<256x256xf32>, vector<8x256xf32> -> vector<8x256xf32>
    %41 = vector.broadcast %4 : vector<1x256xf32> to vector<8x256xf32>
    %42 = arith.addf %40, %41 : vector<8x256xf32>
    %cst_15 = arith.constant 0.000000e+00 : f32
    %43 = vector.broadcast %cst_15 : f32 to vector<8x256xf32>
    %44 = arith.maximumf %42, %43 : vector<8x256xf32>
    %cst_16 = arith.constant dense<0.000000e+00> : vector<256xf32>
    %45 = vector.multi_reduction <add>, %44, %cst_16 [0] : vector<8x256xf32> to vector<256xf32>
    %46 = vector.shape_cast %45 : vector<256xf32> to vector<1x256xf32>
    %cst_17 = arith.constant 8.000000e+00 : f32
    %47 = vector.broadcast %cst_17 : f32 to vector<1x256xf32>
    %48 = arith.divf %46, %47 : vector<1x256xf32>
    %49 = arith.mulf %44, %44 : vector<8x256xf32>
    %cst_18 = arith.constant dense<0.000000e+00> : vector<256xf32>
    %50 = vector.multi_reduction <add>, %49, %cst_18 [0] : vector<8x256xf32> to vector<256xf32>
    %51 = vector.shape_cast %50 : vector<256xf32> to vector<1x256xf32>
    %cst_19 = arith.constant 8.000000e+00 : f32
    %52 = vector.broadcast %cst_19 : f32 to vector<1x256xf32>
    %53 = arith.divf %51, %52 : vector<1x256xf32>
    %54 = arith.mulf %48, %48 : vector<1x256xf32>
    %55 = arith.subf %53, %54 : vector<1x256xf32>
    %cst_20 = arith.constant 0.000000e+00 : f32
    %56 = vector.broadcast %cst_20 : f32 to vector<1x256xf32>
    %57 = arith.maximumf %55, %56 : vector<1x256xf32>
    %58 = vector.broadcast %48 : vector<1x256xf32> to vector<8x256xf32>
    %59 = arith.subf %44, %58 : vector<8x256xf32>
    %cst_21 = arith.constant 9.99999974E-6 : f32
    %60 = vector.broadcast %cst_21 : f32 to vector<1x256xf32>
    %61 = arith.addf %57, %60 : vector<1x256xf32>
    %62 = math.rsqrt %61 : vector<1x256xf32>
    %63 = vector.broadcast %62 : vector<1x256xf32> to vector<8x256xf32>
    %64 = arith.mulf %59, %63 : vector<8x256xf32>
    %65 = vector.broadcast %5 : vector<1x256xf32> to vector<8x256xf32>
    %66 = arith.mulf %64, %65 : vector<8x256xf32>
    %67 = vector.broadcast %6 : vector<1x256xf32> to vector<8x256xf32>
    %68 = arith.addf %66, %67 : vector<8x256xf32>
    %c0_22 = arith.constant 0 : index
    %c0_23 = arith.constant 0 : index
    %69 = vector.load %arg3[%c0_22, %c0_23] : memref<256x256xf32, #tpu.memory_space<vmem>>, vector<256x256xf32>
    %cst_24 = arith.constant dense<0.000000e+00> : vector<8x256xf32>
    %70 = tpu.matmul %68, %69, %cst_24 {dimension_numbers = #tpu.dot_dimension_numbers<[1], [0], [0], [1], [0, 0, 1, 1], [], []>} : vector<8x256xf32>, vector<256x256xf32>, vector<8x256xf32> -> vector<8x256xf32>
    %71 = vector.broadcast %7 : vector<1x256xf32> to vector<8x256xf32>
    %72 = arith.addf %70, %71 : vector<8x256xf32>
    %cst_25 = arith.constant 0.000000e+00 : f32
    %73 = vector.broadcast %cst_25 : f32 to vector<8x256xf32>
    %74 = arith.maximumf %72, %73 : vector<8x256xf32>
    %c0_26 = arith.constant 0 : index
    %c0_27 = arith.constant 0 : index
    %75 = vector.load %arg5[%c0_26, %c0_27] : memref<8x256xf32, #tpu.memory_space<vmem>>, vector<8x256xf32>
    tpu.vector_store %arg5[%c0_26, %c0_27], %74 {strides = array<i32>} : memref<8x256xf32, #tpu.memory_space<vmem>>, vector<8x256xf32>,
    return
  }
}

</mosaic_0001>

<bundles_post_ra>
// kernel: mu_forward.1
= control target key start
LH: loop header
LB: loop body
LE: loop exit
PB: predicated region body
PF: predicated region fallthrough
CT: control target
= control target key end

     0   :  { %10 = vsyncpa [#allocation3], 0  ;;  %s1060_s0 = inlined_call_operand.hbm [shape: f32[8,32], index: 0, kind: input, shape index: {}]   ;;  %s1061_s1 = inlined_call_operand.hbm [shape: f32[32,256], index: 1, kind: input, shape index: {}]   ;;  %s1062_s2 = inlined_call_operand.hbm [shape: f32[256,256], index: 2, kind: input, shape index: {}]   ;;  %s1063_s3 = inlined_call_operand.hbm [shape: f32[256,256], index: 3, kind: input, shape index: {}]   ;;  %s1064_s4 = inlined_call_operand.hbm [shape: f32[8,256], index: 4, kind: input, shape index: {}]   ;;  %s1065_s5 = inlined_call_operand.hbm [shape: f32[8,256], index: 5, kind: output, shape index: {}]  }
   0x1   :  { %11 = vsyncpa [#allocation6], 0 }
   0x2   :  { %12 = vsyncpa [#allocation9], 0 }
   0x3   :  { %13 = vsyncpa [#allocation4], 0  ;;  %s913_s18 = smov [#allocation5]   ;;  %s773_s22 = scalar_lea.hbm %s1061_s1, 1024 }
   0x4   :  { %s29_s19 = sshll.u32 %s913_s18, 4  ;;  %p774_p0 = scmp.ne.s32.totalorder %s1061_s1, %s773_s22  ;;  %s30_s19 = int_to_ptr.vmem [resolvable:$true] %s29_s19 }
   0x5   :  { %p777_p1 = scmp.lt.u32.totalorder %s773_s22, %s1061_s1 }
   0x7   :  { %p779_p2 = pnand %p777_p1, %p774_p0 }
   0x9   :  { %782 = shalt.err (!%p779_p2)
}
   0xa   :  { %s783_s27 = scalar_lea.vmem %s30_s19, 1024  ;;  %p788_p4 = scmp.lt.s32.totalorder %s30_s19, %s30_s19 }
   0xb   :  { %p784_p3 = scmp.ne.s32.totalorder %s30_s19, %s783_s27  ;;  %p789_p5 = scmp.lt.s32.totalorder %s783_s27, %s783_s27 }
   0xd   :  { %p790_p6 = por %p789_p5, %p788_p4 }
   0xf   :  { %p791_p7 = pnand %p790_p6, %p784_p3 }
  0x11   :  { %794 = shalt.err (!%p791_p7)
}
  0x12   :  { %s914_s28 = smov 256   ;;  %s915_s29 = smov 16  }
  0x13   :  { %35 = dma.hbm_to_vmem [thread:$0]  %s1061_s1, 1024, %s30_s19, [#allocation6], %s914_s28, %s914_s28, %s915_s29  }
  0x14   :  { %s916_s7 = smov [#allocation8]   ;;  %s917_s9 = smov [#allocation2]  }
  0x15   :  { %s53_s8 = sshll.u32 %s916_s7, 4  ;;  %s20_s10 = sshll.u32 %s917_s9, 4  ;;  %s54_s8 = int_to_ptr.vmem [resolvable:$true] %s53_s8  ;;  %s21_s10 = int_to_ptr.vmem [resolvable:$true] %s20_s10 }
  0x16   :  { %s795_s13 = scalar_lea.hbm %s1063_s3, 8192 }
  0x17   :  { %p796_p8 = scmp.ne.s32.totalorder %s1063_s3, %s795_s13  ;;  %p799_p9 = scmp.lt.u32.totalorder %s795_s13, %s1063_s3 }
  0x19   :  { %p801_p10 = pnand %p799_p9, %p796_p8 }
  0x1b   :  { %804 = shalt.err (!%p801_p10)
}
  0x1c   :  { %s805_s1 = scalar_lea.vmem %s54_s8, 8192  ;;  %p810_p12 = scmp.lt.s32.totalorder %s54_s8, %s54_s8 }
  0x1d   :  { %p806_p11 = scmp.ne.s32.totalorder %s54_s8, %s805_s1  ;;  %p811_p13 = scmp.lt.s32.totalorder %s805_s1, %s805_s1 }
  0x1f   :  { %p812_p0 = por %p811_p13, %p810_p12 }
  0x21   :  { %p813_p1 = pnand %p812_p0, %p806_p11 }
  0x23   :  { %816 = shalt.err (!%p813_p1)
}
  0x24   :  { %59 = dma.hbm_to_vmem [thread:$0]  %s1063_s3, 8192, %s54_s8, [#allocation9], %s914_s28, %s914_s28, %s915_s29  }
  0x25   :  { %s817_s22 = scalar_lea.hbm %s1060_s0, 128 }
  0x26   :  { %p818_p2 = scmp.ne.s32.totalorder %s1060_s0, %s817_s22  ;;  %p821_p3 = scmp.lt.u32.totalorder %s817_s22, %s1060_s0 }
  0x28   :  { %p823_p4 = pnand %p821_p3, %p818_p2 }
  0x2a   :  { %826 = shalt.err (!%p823_p4)
}
  0x2b   :  { %s827_s27 = scalar_lea.vmem %s21_s10, 128  ;;  %p832_p6 = scmp.lt.s32.totalorder %s21_s10, %s21_s10 }
  0x2c   :  { %p828_p5 = scmp.ne.s32.totalorder %s21_s10, %s827_s27  ;;  %p833_p7 = scmp.lt.s32.totalorder %s827_s27, %s827_s27 }
  0x2e   :  { %p834_p8 = por %p833_p7, %p832_p6 }
  0x30   :  { %p835_p9 = pnand %p834_p8, %p828_p5 }
  0x32   :  { %838 = shalt.err (!%p835_p9)
}
  0x33   :  { %23 = dma.hbm_to_vmem [thread:$0]  %s1060_s0, 128, %s21_s10, [#allocation3]  }
  0x34   :  { %s918_s6 = smov [#allocation7]   ;;  %s919_s8 = smov [#allocation10]  }
  0x35   :  { %s41_s7 = sshll.u32 %s918_s6, 4  ;;  %s66_s9 = sshll.u32 %s919_s8, 4  ;;  %s42_s7 = int_to_ptr.vmem [resolvable:$true] %s41_s7  ;;  %s67_s9 = int_to_ptr.vmem [resolvable:$true] %s66_s9 }
  0x36   :  { %s839_s13 = scalar_lea.hbm %s1062_s2, 8192 }
  0x37   :  { %p840_p10 = scmp.ne.s32.totalorder %s1062_s2, %s839_s13  ;;  %p843_p11 = scmp.lt.u32.totalorder %s839_s13, %s1062_s2 }
  0x39   :  { %p845_p12 = pnand %p843_p11, %p840_p10 }
  0x3b   :  { %848 = shalt.err (!%p845_p12)
}
  0x3c   :  { %s849_s0 = scalar_lea.vmem %s42_s7, 8192  ;;  %p854_p0 = scmp.lt.s32.totalorder %s42_s7, %s42_s7 }
  0x3d   :  { %p850_p13 = scmp.ne.s32.totalorder %s42_s7, %s849_s0  ;;  %p855_p1 = scmp.lt.s32.totalorder %s849_s0, %s849_s0 }
  0x3f   :  { %p856_p2 = por %p855_p1, %p854_p0 }
  0x41   :  { %p857_p3 = pnand %p856_p2, %p850_p13 }
  0x43   :  { %860 = shalt.err (!%p857_p3)
}
  0x44   :  { %47 = dma.hbm_to_vmem [thread:$0]  %s1062_s2, 8192, %s42_s7, [#allocation6], %s914_s28, %s914_s28, %s915_s29  }
  0x45   :  { %s861_s20 = scalar_lea.hbm %s1064_s4, 256 }
  0x46   :  { %p862_p4 = scmp.ne.s32.totalorder %s1064_s4, %s861_s20  ;;  %p865_p5 = scmp.lt.u32.totalorder %s861_s20, %s1064_s4 }
  0x48   :  { %p867_p6 = pnand %p865_p5, %p862_p4 }
  0x4a   :  { %870 = shalt.err (!%p867_p6)
}
  0x4b   :  { %s871_s25 = scalar_lea.vmem %s67_s9, 256  ;;  %p876_p8 = scmp.lt.s32.totalorder %s67_s9, %s67_s9 }
  0x4c   :  { %p872_p7 = scmp.ne.s32.totalorder %s67_s9, %s871_s25  ;;  %p877_p9 = scmp.lt.s32.totalorder %s871_s25, %s871_s25 }
  0x4e   :  { %p878_p10 = por %p877_p9, %p876_p8 }
  0x50   :  { %p879_p11 = pnand %p878_p10, %p872_p7 }
  0x52   :  { %882 = shalt.err (!%p879_p11)
}
  0x53   :  { %69 = dma.hbm_to_vmem [thread:$0]  %s1064_s4, 256, %s67_s9, [#allocation9]  }
  0x54   :  { %905 = dma.done.wait [#allocation3], 128  }
  0x55   :  { %906 = vsyncadd [#allocation3], 4294967168 }
  0x56   :  { %907 = dma.done.wait [#allocation6], 9216  }
  0x57   :  { %908 = vsyncadd [#allocation6], 4294958080 }
  0x58   :  { %909 = dma.done.wait [#allocation9], 8448  }
  0x59   :  { %910 = vsyncadd [#allocation9], 4294958848  ;;  %v920_v0 = vmov 0.0   ;;  %v89_v1 = vld [vmem:[#allocation5 + $0x8] sm:$0xff]  ;;  %v91_v2 = vld [vmem:[#allocation5 + $0x18] sm:$0xff]  ;;  %vm104_vm0 = vcmask 261120  }
  0x5a   :  { %172 = vmatprep.mubr.f32.mxu0 %v920_v0  ;;  %v88_v3 = vld [vmem:[#allocation5] sm:$0xff]  ;;  %v620_v4 = vpack.c.bf16 %v91_v2, %v89_v1  ;;  %v90_v5 = vld [vmem:[#allocation5 + $0x10] sm:$0xff]  ;;  %v93_v6 = vld [vmem:[#allocation5 + $0x28] sm:$0xff]  ;;  %s921_s4 = smov [#allocation11]  }
  0x5b   :  { %v95_v7 = vld [vmem:[#allocation5 + $0x38] sm:$0xff]  ;;  %v622_v8 = vpack.c.bf16 %v90_v5, %v88_v3  ;;  %v92_v10 = vld [vmem:[#allocation5 + $0x20] sm:$0xff]  ;;  %v94_v11 = vld [vmem:[#allocation5 + $0x30] sm:$0xff]  ;;  %s608_s29 = sshll.u32 %s921_s4, 4  ;;  %s609_s29 = int_to_ptr.vmem [resolvable:$true] %s608_s29 }
  0x5c   :  { %v624_v9 = vpack.c.bf16 %v95_v7, %v93_v6  ;;  %621 = vmatprep.subr.bf16.mxu0 %v620_v4  ;;  %v247_v12 = vld [vmem:[#allocation7 + $0x8] sm:$0xff]  ;;  %v249_v13 = vld [vmem:[#allocation7 + $0x18] sm:$0xff]  ;;  %v246_v14 = vld [vmem:[#allocation7] sm:$0xff]  ;;  %v626_v15 = vpack.c.bf16 %v94_v11, %v92_v10  ;;  %s883_s26 = scalar_lea.vmem %s609_s29, 256  ;;  %p888_p13 = scmp.lt.s32.totalorder %s609_s29, %s609_s29 }
  0x5d   :  { %623 = vmatpush1.bf16.msra.mxu0 %v622_v8  ;;  %v628_v16 = vpack.c.bf16 %v249_v13, %v247_v12  ;;  %v248_v17 = vld [vmem:[#allocation7 + $0x10] sm:$0xff]  ;;  %v251_v18 = vld [vmem:[#allocation7 + $0x28] sm:$0xff]  ;;  %v253_v19 = vld [vmem:[#allocation7 + $0x38] sm:$0xff]  ;;  %p884_p12 = scmp.ne.s32.totalorder %s609_s29, %s883_s26  ;;  %p889_p0 = scmp.lt.s32.totalorder %s883_s26, %s883_s26 }
  0x5e   :  { %625 = vmatprep.subr.bf16.mxu0 %v624_v9  ;;  %v630_v20 = vpack.c.bf16 %v248_v17, %v246_v14  ;;  %v632_v21 = vpack.c.bf16 %v253_v19, %v251_v18  ;;  %v250_v22 = vld [vmem:[#allocation7 + $0x20] sm:$0xff]  ;;  %v252_v23 = vld [vmem:[#allocation7 + $0x30] sm:$0xff]  ;;  %v255_v24 = vld [vmem:[#allocation7 + $0x48] sm:$0xff] }
  0x5f   :  { %629 = vmatprep.subr.bf16.mxu1 %v628_v16  ;;  %v257_v25 = vld [vmem:[#allocation7 + $0x58] sm:$0xff]  ;;  %v634_v26 = vpack.c.bf16 %v252_v23, %v250_v22  ;;  %v254_v29 = vld [vmem:[#allocation7 + $0x40] sm:$0xff]  ;;  %v256_v30 = vld [vmem:[#allocation7 + $0x50] sm:$0xff]  ;;  %p890_p1 = por %p889_p0, %p888_p13 }
  0x60   :  { %631 = vmatpush1.bf16.msra.mxu1 %v630_v20  ;;  %v87_v27 = vld [vmem:[#allocation2] sm:$0xff]  ;;  %v636_v28 = vpack.c.bf16 %v257_v25, %v255_v24  ;;  %v259_v31 = vld [vmem:[#allocation7 + $0x68] sm:$0xff]  ;;  %v638_v33 = vpack.c.bf16 %v256_v30, %v254_v29  ;;  %v258_v35 = vld [vmem:[#allocation7 + $0x60] sm:$0xff] }
  0x61   :  { %627 = vmatpush1.bf16.msra.mxu0 %v626_v15  ;;  %633 = vmatprep.subr.bf16.mxu1 %v632_v21  ;;  %v261_v32 = vld [vmem:[#allocation7 + $0x78] sm:$0xff]  ;;  %v260_v36 = vld [vmem:[#allocation7 + $0x70] sm:$0xff]  ;;  %v263_v37 = vld [vmem:[#allocation7 + $0x88] sm:$0xff]  ;;  %p891_p2 = pnand %p890_p1, %p884_p12 }
  0x62   :  { %v640_v34 = vpack.c.bf16 %v261_v32, %v259_v31  ;;  %v265_v38 = vld [vmem:[#allocation7 + $0x98] sm:$0xff]  ;;  %v642_v39 = vpack.c.bf16 %v260_v36, %v258_v35  ;;  %v262_v41 = vld [vmem:[#allocation7 + $0x80] sm:$0xff]  ;;  %v264_v42 = vld [vmem:[#allocation7 + $0x90] sm:$0xff] }
  0x63   :  { %v644_v40 = vpack.c.bf16 %v265_v38, %v263_v37  ;;  %v646_v43 = vpack.c.bf16 %v264_v42, %v262_v41  ;;  %v267_v44 = vld [vmem:[#allocation7 + $0xa8] sm:$0xff]  ;;  %v269_v45 = vld [vmem:[#allocation7 + $0xb8] sm:$0xff]  ;;  %v266_v47 = vld [vmem:[#allocation7 + $0xa0] sm:$0xff] }
  0x64   :  { %619 = vmatmul.mubr.msk.f32.vlgmr.msra.gmra.mrb[0].mxu0 %vm104_vm0, %v87_v27  ;;  %635 = vmatpush1.bf16.msra.mxu1 %v634_v26  ;;  %v648_v46 = vpack.c.bf16 %v269_v45, %v267_v44  ;;  %v268_v48 = vld [vmem:[#allocation7 + $0xb0] sm:$0xff]  ;;  %v271_v50 = vld [vmem:[#allocation7 + $0xc8] sm:$0xff]  ;;  %v273_v51 = vld [vmem:[#allocation7 + $0xd8] sm:$0xff] }
  0x65   :  { %637 = vmatprep.subr.bf16.mxu1 %v636_v28  ;;  %v650_v49 = vpack.c.bf16 %v268_v48, %v266_v47  ;;  %v652_v52 = vpack.c.bf16 %v273_v51, %v271_v50  ;;  %v270_v53 = vld [vmem:[#allocation7 + $0xc0] sm:$0xff]  ;;  %v272_v54 = vld [vmem:[#allocation7 + $0xd0] sm:$0xff]  ;;  %v275_v56 = vld [vmem:[#allocation7 + $0xe8] sm:$0xff] }
  0x66   :  { %v654_v55 = vpack.c.bf16 %v272_v54, %v270_v53  ;;  %v277_v57 = vld [vmem:[#allocation7 + $0xf8] sm:$0xff]  ;;  %v274_v59 = vld [vmem:[#allocation7 + $0xe0] sm:$0xff]  ;;  %v276_v60 = vld [vmem:[#allocation7 + $0xf0] sm:$0xff] }
  0x67   :  { %v656_v58 = vpack.c.bf16 %v277_v57, %v275_v56  ;;  %v658_v61 = vpack.c.bf16 %v276_v60, %v274_v59  ;;  %v279_v62 = vld [vmem:[#allocation7 + $0x108] sm:$0xff]  ;;  %v281_v63 = vld [vmem:[#allocation7 + $0x118] sm:$0xff]  ;;  %v278_v1 = vld [vmem:[#allocation7 + $0x100] sm:$0xff] }
  0x68   :  { %639 = vmatpush1.bf16.msra.mxu1 %v638_v33  ;;  %v660_v0 = vpack.c.bf16 %v281_v63, %v279_v62  ;;  %v280_v2 = vld [vmem:[#allocation7 + $0x110] sm:$0xff]  ;;  %v283_v4 = vld [vmem:[#allocation7 + $0x128] sm:$0xff]  ;;  %v285_v5 = vld [vmem:[#allocation7 + $0x138] sm:$0xff] }
  0x69   :  { %641 = vmatprep.subr.bf16.mxu1 %v640_v34  ;;  %v662_v3 = vpack.c.bf16 %v280_v2, %v278_v1  ;;  %v664_v6 = vpack.c.bf16 %v285_v5, %v283_v4  ;;  %v282_v7 = vld [vmem:[#allocation7 + $0x120] sm:$0xff]  ;;  %v284_v8 = vld [vmem:[#allocation7 + $0x130] sm:$0xff]  ;;  %v287_v10 = vld [vmem:[#allocation7 + $0x148] sm:$0xff] }
  0x6a   :  { %v666_v9 = vpack.c.bf16 %v284_v8, %v282_v7  ;;  %v289_v11 = vld [vmem:[#allocation7 + $0x158] sm:$0xff]  ;;  %v286_v13 = vld [vmem:[#allocation7 + $0x140] sm:$0xff]  ;;  %v288_v14 = vld [vmem:[#allocation7 + $0x150] sm:$0xff] }
  0x6b   :  { %v668_v12 = vpack.c.bf16 %v289_v11, %v287_v10  ;;  %v670_v15 = vpack.c.bf16 %v288_v14, %v286_v13  ;;  %v291_v16 = vld [vmem:[#allocation7 + $0x168] sm:$0xff]  ;;  %v293_v17 = vld [vmem:[#allocation7 + $0x178] sm:$0xff]  ;;  %v290_v19 = vld [vmem:[#allocation7 + $0x160] sm:$0xff] }
  0x6c   :  { %643 = vmatpush1.bf16.msra.mxu1 %v642_v39  ;;  %v672_v18 = vpack.c.bf16 %v293_v17, %v291_v16  ;;  %v292_v20 = vld [vmem:[#allocation7 + $0x170] sm:$0xff]  ;;  %v295_v22 = vld [vmem:[#allocation7 + $0x188] sm:$0xff]  ;;  %v297_v23 = vld [vmem:[#allocation7 + $0x198] sm:$0xff] }
  0x6d   :  { %645 = vmatprep.subr.bf16.mxu1 %v644_v40  ;;  %v674_v21 = vpack.c.bf16 %v292_v20, %v290_v19  ;;  %v294_v24 = vld [vmem:[#allocation7 + $0x180] sm:$0xff]  ;;  %v676_v25 = vpack.c.bf16 %v297_v23, %v295_v22  ;;  %v296_v26 = vld [vmem:[#allocation7 + $0x190] sm:$0xff]  ;;  %v299_v27 = vld [vmem:[#allocation7 + $0x1a8] sm:$0xff] }
  0x6e   :  { %v301_v28 = vld [vmem:[#allocation7 + $0x1b8] sm:$0xff]  ;;  %v678_v29 = vpack.c.bf16 %v296_v26, %v294_v24  ;;  %v298_v31 = vld [vmem:[#allocation7 + $0x1a0] sm:$0xff]  ;;  %v300_v32 = vld [vmem:[#allocation7 + $0x1b0] sm:$0xff] }
  0x6f   :  { %v680_v30 = vpack.c.bf16 %v301_v28, %v299_v27  ;;  %v303_v33 = vld [vmem:[#allocation7 + $0x1c8] sm:$0xff]  ;;  %v305_v34 = vld [vmem:[#allocation7 + $0x1d8] sm:$0xff]  ;;  %v682_v35 = vpack.c.bf16 %v300_v32, %v298_v31  ;;  %v302_v37 = vld [vmem:[#allocation7 + $0x1c0] sm:$0xff] }
  0x70   :  { %647 = vmatpush1.bf16.msra.mxu1 %v646_v43  ;;  %v684_v36 = vpack.c.bf16 %v305_v34, %v303_v33  ;;  %v304_v38 = vld [vmem:[#allocation7 + $0x1d0] sm:$0xff]  ;;  %v307_v39 = vld [vmem:[#allocation7 + $0x1e8] sm:$0xff]  ;;  %v309_v40 = vld [vmem:[#allocation7 + $0x1f8] sm:$0xff] }
  0x71   :  { %649 = vmatprep.subr.bf16.mxu1 %v648_v46  ;;  %v686_v41 = vpack.c.bf16 %v304_v38, %v302_v37  ;;  %v688_v42 = vpack.c.bf16 %v309_v40, %v307_v39  ;;  %v306_v43 = vld [vmem:[#allocation7 + $0x1e0] sm:$0xff]  ;;  %v308_v44 = vld [vmem:[#allocation7 + $0x1f0] sm:$0xff]  ;;  %v456_v46 = vld [vmem:[#allocation8 + $0x8] sm:$0xff] }
  0x72   :  { %v690_v45 = vpack.c.bf16 %v308_v44, %v306_v43  ;;  %v458_v47 = vld [vmem:[#allocation8 + $0x18] sm:$0xff]  ;;  %v455_v48 = vld [vmem:[#allocation8] sm:$0xff]  ;;  %v457_v50 = vld [vmem:[#allocation8 + $0x10] sm:$0xff] }
  0x73   :  { %v460_v51 = vld [vmem:[#allocation8 + $0x28] sm:$0xff]  ;;  %v694_v53 = vpack.c.bf16 %v457_v50, %v455_v48  ;;  %v461_v56 = vld [vmem:[#allocation8 + $0x30] sm:$0xff] }
  0x74   :  { %651 = vmatpush1.bf16.msra.mxu1 %v650_v49  ;;  %v692_v49 = vpack.c.bf16 %v458_v47, %v456_v46  ;;  %v464_v57 = vld [vmem:[#allocation8 + $0x48] sm:$0xff]  ;;  %v465_v62 = vld [vmem:[#allocation8 + $0x50] sm:$0xff] }
  0x75   :  { %653 = vmatprep.subr.bf16.mxu1 %v652_v52  ;;  %v462_v52 = vld [vmem:[#allocation8 + $0x38] sm:$0xff]  ;;  %v468_v63 = vld [vmem:[#allocation8 + $0x68] sm:$0xff]  ;;  %v469_v4 = vld [vmem:[#allocation8 + $0x70] sm:$0xff] }
  0x76   :  { %v696_v54 = vpack.c.bf16 %v462_v52, %v460_v51  ;;  %693 = vmatprep.subr.bf16.mxu0 %v692_v49  ;;  %v472_v5 = vld [vmem:[#allocation8 + $0x88] sm:$0xff]  ;;  %v473_v10 = vld [vmem:[#allocation8 + $0x90] sm:$0xff] }
  0x77   :  { %695 = vmatpush1.bf16.msra.mxu0 %v694_v53  ;;  %v1026_v16 = vld [vmem:[#allocation10 + $0x8] sm:$0xff] }
  0x78   :  { %655 = vmatpush1.bf16.msra.mxu1 %v654_v55  ;;  %v459_v55 = vld [vmem:[#allocation8 + $0x20] sm:$0xff]  ;;  %697 = vmatprep.subr.bf16.mxu0 %v696_v54 }
  0x79   :  { %657 = vmatprep.subr.bf16.mxu1 %v656_v58  ;;  %v466_v58 = vld [vmem:[#allocation8 + $0x58] sm:$0xff]  ;;  %v698_v59 = vpack.c.bf16 %v461_v56, %v459_v55 }
  0x7a   :  { %v700_v60 = vpack.c.bf16 %v466_v58, %v464_v57 }
  0x7b   :  { %699 = vmatpush1.bf16.msra.mxu0 %v698_v59 }
  0x7c   :  { %659 = vmatpush1.bf16.msra.mxu1 %v658_v61  ;;  %v463_v61 = vld [vmem:[#allocation8 + $0x40] sm:$0xff]  ;;  %701 = vmatprep.subr.bf16.mxu0 %v700_v60 }
  0x7d   :  { %661 = vmatprep.subr.bf16.mxu1 %v660_v0  ;;  %v470_v0 = vld [vmem:[#allocation8 + $0x78] sm:$0xff]  ;;  %v702_v1 = vpack.c.bf16 %v465_v62, %v463_v61 }
  0x7e   :  { %v704_v2 = vpack.c.bf16 %v470_v0, %v468_v63 }
  0x7f   :  { %703 = vmatpush1.bf16.msra.mxu0 %v702_v1 }
  0x80   :  { %663 = vmatpush1.bf16.msra.mxu1 %v662_v3  ;;  %v467_v3 = vld [vmem:[#allocation8 + $0x60] sm:$0xff]  ;;  %705 = vmatprep.subr.bf16.mxu0 %v704_v2 }
  0x81   :  { %665 = vmatprep.subr.bf16.mxu1 %v664_v6  ;;  %v474_v6 = vld [vmem:[#allocation8 + $0x98] sm:$0xff]  ;;  %v706_v7 = vpack.c.bf16 %v469_v4, %v467_v3 }
  0x82   :  { %v708_v8 = vpack.c.bf16 %v474_v6, %v472_v5 }
  0x83   :  { %707 = vmatpush1.bf16.msra.mxu0 %v706_v7 }
  0x84   :  { %667 = vmatpush1.bf16.msra.mxu1 %v666_v9  ;;  %v471_v9 = vld [vmem:[#allocation8 + $0x80] sm:$0xff]  ;;  %709 = vmatprep.subr.bf16.mxu0 %v708_v8 }
  0x85   :  { %669 = vmatprep.subr.bf16.mxu1 %v668_v12  ;;  %v710_v11 = vpack.c.bf16 %v473_v10, %v471_v9  ;;  %v96_v12 = vlaneseq }
  0x87   :  { %711 = vmatpush1.bf16.msra.mxu0 %v710_v11  ;;  %v1021_v13 = vshrl.u32 %v96_v12, 7 }
  0x88   :  { %671 = vmatpush1.bf16.msra.mxu1 %v670_v15  ;;  %v1024_v15 = vld [vmem:[#allocation10] sm:$0xff] }
  0x89   :  { %673 = vmatprep.subr.bf16.mxu1 %v672_v18  ;;  %v98_v14 = vsub.s32 0, %v1021_v13  ;;  %v228_v63 = vsub.s32 1, %v1021_v13  ;;  %v238_v0 = vsub.s32 2, %v1021_v13 }
  0x8b   :  { %v99_v17 = vrot.slane %v1024_v15, %v98_v14  ;;  %v103_v18 = vrot.slane %v1026_v16, %v98_v14  ;;  %v229_v2 = vrot.slane %v1024_v15, %v228_v63  ;;  %v233_v5 = vrot.slane %v1026_v16, %v228_v63  ;;  %v503_v63 = vld [vmem:[#allocation8 + $0x180] sm:$0xff] }
  0x8c   :  { %675 = vmatpush1.bf16.msra.mxu1 %v674_v21  ;;  %v243_v9 = vrot.slane %v1026_v16, %v238_v0  ;;  %v239_v11 = vrot.slane %v1024_v15, %v238_v0  ;;  %v505_v0 = vld [vmem:[#allocation8 + $0x190] sm:$0xff] }
  0x8d   :  { %677 = vmatprep.subr.bf16.mxu1 %v676_v25 }
  0x90   :  { %679 = vmatpush1.bf16.msra.mxu1 %v678_v29 }
  0x91   :  { %681 = vmatprep.subr.bf16.mxu1 %v680_v30 }
  0x94   :  { %683 = vmatpush1.bf16.msra.mxu1 %v682_v35 }
  0x95   :  { %685 = vmatprep.subr.bf16.mxu1 %v684_v36 }
  0x98   :  { %687 = vmatpush1.bf16.msra.mxu1 %v686_v41 }
  0x99   :  { %689 = vmatprep.subr.bf16.mxu1 %v688_v42 }
  0x9c   :  { %691 = vmatpush1.bf16.msra.mxu1 %v690_v45 }
 0x137   :  { %v174_v19 = vpop.f32.mrb[0].mxu0 }
 0x138   :  { %v175_v20 = vadd.f32 %v174_v19, %v99_v17  ;;  %v176_v21 = vpop.f32.mrb[1].mxu0  ;;  %v478_v19 = vld [vmem:[#allocation8 + $0xb8] sm:$0xff] }
 0x139   :  { %v177_v22 = vadd.f32 %v176_v21, %v103_v18  ;;  %v476_v18 = vld [vmem:[#allocation8 + $0xa8] sm:$0xff]  ;;  %v475_v21 = vld [vmem:[#allocation8 + $0xa0] sm:$0xff] }
 0x13a   :  { %v179_v23 = vmax.f32 %v175_v20, 0.0  ;;  %v712_v20 = vpack.c.bf16 %v478_v19, %v476_v18  ;;  %v518_v18 = vld [vmem:[#allocation8 + $0x1f8] sm:$0xff]  ;;  %v515_v19 = vld [vmem:[#allocation8 + $0x1e0] sm:$0xff] }
 0x13b   :  { %v180_v24 = vmax.f32 %v177_v22, 0.0  ;;  %v477_v22 = vld [vmem:[#allocation8 + $0xb0] sm:$0xff] }
 0x13c   :  { %v181_v25 = vrot.slane %v179_v23, 4  ;;  %v196_v26 = vmul.f32 %v179_v23, %v179_v23  ;;  %713 = vmatprep.subr.bf16.mxu0 %v712_v20 }
 0x13d   :  { %v187_v27 = vrot.slane %v180_v24, 4  ;;  %v197_v28 = vmul.f32 %v180_v24, %v180_v24 }
 0x13e   :  { %v182_v29 = vadd.f32 %v181_v25, %v179_v23  ;;  %v198_v30 = vrot.slane %v196_v26, 4  ;;  %v482_v25 = vld [vmem:[#allocation8 + $0xd8] sm:$0xff] }
 0x13f   :  { %v188_v31 = vadd.f32 %v187_v27, %v180_v24  ;;  %v204_v32 = vrot.slane %v197_v28, 4  ;;  %v479_v27 = vld [vmem:[#allocation8 + $0xc0] sm:$0xff] }
 0x140   :  { %v183_v33 = vrot.slane %v182_v29, 2  ;;  %v199_v34 = vadd.f32 %v198_v30, %v196_v26  ;;  %v484_v30 = vld [vmem:[#allocation8 + $0xe8] sm:$0xff] }
 0x141   :  { %v189_v35 = vrot.slane %v188_v31, 2  ;;  %v205_v36 = vadd.f32 %v204_v32, %v197_v28  ;;  %v481_v28 = vld [vmem:[#allocation8 + $0xd0] sm:$0xff] }
 0x142   :  { %v184_v37 = vadd.f32 %v183_v33, %v182_v29  ;;  %v200_v38 = vrot.slane %v199_v34, 2  ;;  %v718_v29 = vpack.c.bf16 %v481_v28, %v479_v27  ;;  %v483_v33 = vld [vmem:[#allocation8 + $0xe0] sm:$0xff] }
 0x143   :  { %v206_v39 = vrot.slane %v205_v36, 2  ;;  %v190_v40 = vadd.f32 %v189_v35, %v188_v31  ;;  %v486_v31 = vld [vmem:[#allocation8 + $0xf8] sm:$0xff] }
 0x144   :  { %v185_v41 = vrot.slane %v184_v37, 1  ;;  %v201_v42 = vadd.f32 %v200_v38, %v199_v34  ;;  %v720_v32 = vpack.c.bf16 %v486_v31, %v484_v30  ;;  %v485_v34 = vld [vmem:[#allocation8 + $0xf0] sm:$0xff] }
 0x145   :  { %v207_v43 = vadd.f32 %v206_v39, %v205_v36  ;;  %v191_v44 = vrot.slane %v190_v40, 1  ;;  %v722_v35 = vpack.c.bf16 %v485_v34, %v483_v33  ;;  %v488_v36 = vld [vmem:[#allocation8 + $0x108] sm:$0xff]  ;;  %v487_v39 = vld [vmem:[#allocation8 + $0x100] sm:$0xff] }
 0x146   :  { %v186_v45 = vadd.f32 %v185_v41, %v184_v37  ;;  %v202_v46 = vrot.slane %v201_v42, 1  ;;  %v490_v37 = vld [vmem:[#allocation8 + $0x118] sm:$0xff] }
 0x147   :  { %v208_v47 = vrot.slane %v207_v43, 1  ;;  %v192_v48 = vadd.f32 %v191_v44, %v190_v40  ;;  %v724_v38 = vpack.c.bf16 %v490_v37, %v488_v36  ;;  %v489_v40 = vld [vmem:[#allocation8 + $0x110] sm:$0xff] }
 0x148   :  { %v194_v49 = vmul.f32 0.125, %v186_v45  ;;  %v203_v50 = vadd.f32 %v202_v46, %v201_v42  ;;  %v726_v41 = vpack.c.bf16 %v489_v40, %v487_v39  ;;  %v492_v42 = vld [vmem:[#allocation8 + $0x128] sm:$0xff]  ;;  %v491_v45 = vld [vmem:[#allocation8 + $0x120] sm:$0xff]  ;;  %v493_v46 = vld [vmem:[#allocation8 + $0x130] sm:$0xff] }
 0x149   :  { %v195_v51 = vmul.f32 0.125, %v192_v48  ;;  %v209_v52 = vadd.f32 %v208_v47, %v207_v43  ;;  %v494_v43 = vld [vmem:[#allocation8 + $0x138] sm:$0xff]  ;;  %v730_v47 = vpack.c.bf16 %v493_v46, %v491_v45  ;;  %v496_v48 = vld [vmem:[#allocation8 + $0x148] sm:$0xff] }
 0x14a   :  { %v210_v53 = vmul.f32 0.125, %v203_v50  ;;  %v212_v54 = vmul.f32 %v194_v49, %v194_v49  ;;  %v218_v1 = vsub.f32 %v179_v23, %v194_v49  ;;  %v714_v23 = vpack.c.bf16 %v477_v22, %v475_v21  ;;  %v498_v49 = vld [vmem:[#allocation8 + $0x158] sm:$0xff]  ;;  %v517_v21 = vld [vmem:[#allocation8 + $0x1f0] sm:$0xff] }
 0x14b   :  { %v211_v55 = vmul.f32 0.125, %v209_v52  ;;  %v213_v56 = vmul.f32 %v195_v51, %v195_v51  ;;  %v219_v4 = vsub.f32 %v180_v24, %v195_v51  ;;  %v480_v24 = vld [vmem:[#allocation8 + $0xc8] sm:$0xff]  ;;  %v728_v44 = vpack.c.bf16 %v494_v43, %v492_v42  ;;  %v495_v51 = vld [vmem:[#allocation8 + $0x140] sm:$0xff]  ;;  %v497_v52 = vld [vmem:[#allocation8 + $0x150] sm:$0xff] }
 0x14c   :  { %v214_v57 = vsub.f32 %v210_v53, %v212_v54  ;;  %715 = vmatpush1.bf16.msra.mxu0 %v714_v23  ;;  %v716_v26 = vpack.c.bf16 %v482_v25, %v480_v24  ;;  %v732_v50 = vpack.c.bf16 %v498_v49, %v496_v48  ;;  %v734_v53 = vpack.c.bf16 %v497_v52, %v495_v51  ;;  %v500_v54 = vld [vmem:[#allocation8 + $0x168] sm:$0xff] }
 0x14d   :  { %v215_v58 = vsub.f32 %v211_v55, %v213_v56  ;;  %v502_v55 = vld [vmem:[#allocation8 + $0x178] sm:$0xff]  ;;  %v754_v22 = vpack.c.bf16 %v517_v21, %v515_v19  ;;  %v312_v23 = vsub.s32 3, %v1021_v13 }
 0x14e   :  { %v216_v59 = vmax.f32 %v214_v57, 0.0  ;;  %717 = vmatprep.subr.bf16.mxu0 %v716_v26  ;;  %v736_v56 = vpack.c.bf16 %v502_v55, %v500_v54  ;;  %v499_v57 = vld [vmem:[#allocation8 + $0x160] sm:$0xff] }
 0x14f   :  { %v217_v60 = vmax.f32 %v215_v58, 0.0  ;;  %v501_v58 = vld [vmem:[#allocation8 + $0x170] sm:$0xff]  ;;  %v313_v24 = vrot.slane %v1024_v15, %v312_v23  ;;  %v317_v25 = vrot.slane %v1026_v16, %v312_v23 }
 0x150   :  { %v220_v61 = vadd.f32 1e-05, %v216_v59  ;;  %719 = vmatpush1.bf16.msra.mxu0 %v718_v29  ;;  %v738_v59 = vpack.c.bf16 %v501_v58, %v499_v57 }
 0x151   :  { %v221_v62 = vadd.f32 1e-05, %v217_v60  ;;  %721 = vmatprep.subr.bf16.mxu0 %v720_v32  ;;  %v504_v60 = vld [vmem:[#allocation8 + $0x188] sm:$0xff] }
 0x152   :  { %765 = vrsqrt.f32 %v220_v61  ;;  %v506_v61 = vld [vmem:[#allocation8 + $0x198] sm:$0xff] }
 0x153   :  { %767 = vrsqrt.f32 %v221_v62  ;;  %v740_v62 = vpack.c.bf16 %v506_v61, %v504_v60 }
 0x154   :  { %723 = vmatpush1.bf16.msra.mxu0 %v722_v35 }
 0x155   :  { %725 = vmatprep.subr.bf16.mxu0 %v724_v38 }
 0x158   :  { %727 = vmatpush1.bf16.msra.mxu0 %v726_v41 }
 0x159   :  { %729 = vmatprep.subr.bf16.mxu0 %v728_v44 }
 0x15c   :  { %v766_v3 = vpop.eup %765  ;;  %731 = vmatpush1.bf16.msra.mxu0 %v730_v47 }
 0x15d   :  { %v768_v6 = vpop.eup %767  ;;  %v224_v7 = vmul.f32 %v766_v3, %v218_v1  ;;  %733 = vmatprep.subr.bf16.mxu0 %v732_v50  ;;  %v742_v1 = vpack.c.bf16 %v505_v0, %v503_v63  ;;  %v510_v3 = vld [vmem:[#allocation8 + $0x1b8] sm:$0xff] }
 0x15e   :  { %v225_v8 = vmul.f32 %v768_v6, %v219_v4  ;;  %v509_v6 = vld [vmem:[#allocation8 + $0x1b0] sm:$0xff] }
 0x15f   :  { %v234_v10 = vmul.f32 %v229_v2, %v224_v7  ;;  %v508_v2 = vld [vmem:[#allocation8 + $0x1a8] sm:$0xff] }
 0x160   :  { %v235_v12 = vmul.f32 %v233_v5, %v225_v8  ;;  %735 = vmatpush1.bf16.msra.mxu0 %v734_v53  ;;  %v744_v4 = vpack.c.bf16 %v510_v3, %v508_v2  ;;  %v507_v5 = vld [vmem:[#allocation8 + $0x1a0] sm:$0xff]  ;;  %v512_v8 = vld [vmem:[#allocation8 + $0x1c8] sm:$0xff] }
 0x161   :  { %v244_v17 = vadd.f32 %v239_v11, %v234_v10  ;;  %737 = vmatprep.subr.bf16.mxu0 %v736_v56  ;;  %v746_v7 = vpack.c.bf16 %v509_v6, %v507_v5  ;;  %v511_v11 = vld [vmem:[#allocation8 + $0x1c0] sm:$0xff]  ;;  %v437_v6 = vsub.s32 4, %v1021_v13 }
 0x162   :  { %v245_v14 = vadd.f32 %v243_v9, %v235_v12  ;;  %v514_v9 = vld [vmem:[#allocation8 + $0x1d8] sm:$0xff]  ;;  %v513_v12 = vld [vmem:[#allocation8 + $0x1d0] sm:$0xff] }
 0x163   :  { %v748_v10 = vpack.c.bf16 %v514_v9, %v512_v8  ;;  %v438_v9 = vrot.slane %v1024_v15, %v437_v6 }
 0x164   :  { %382 = vmatprep.mubr.f32.mxu1 %v245_v14  ;;  %739 = vmatpush1.bf16.msra.mxu0 %v738_v59  ;;  %v750_v14 = vpack.c.bf16 %v513_v12, %v511_v11  ;;  %v442_v12 = vrot.slane %v1026_v16, %v437_v6 }
 0x165   :  { %383 = vmatmul.mubr.f32.vlgmr.msra.gmra.mrb[0].mxu1 %v244_v17  ;;  %741 = vmatprep.subr.bf16.mxu0 %v740_v62  ;;  %v516_v17 = vld [vmem:[#allocation8 + $0x1e8] sm:$0xff] }
 0x166   :  { %v752_v20 = vpack.c.bf16 %v518_v18, %v516_v17 }
 0x168   :  { %743 = vmatpush1.bf16.msra.mxu0 %v742_v1 }
 0x169   :  { %745 = vmatprep.subr.bf16.mxu0 %v744_v4 }
 0x16c   :  { %747 = vmatpush1.bf16.msra.mxu0 %v746_v7  ;;  %v447_v7 = vsub.s32 5, %v1021_v13 }
 0x16d   :  { %749 = vmatprep.subr.bf16.mxu0 %v748_v10 }
 0x16e   :  { %v452_v19 = vrot.slane %v1026_v16, %v447_v7  ;;  %v448_v21 = vrot.slane %v1024_v15, %v447_v7 }
 0x170   :  { %751 = vmatpush1.bf16.msra.mxu0 %v750_v14 }
 0x171   :  { %753 = vmatprep.subr.bf16.mxu0 %v752_v20 }
 0x174   :  { %755 = vmatpush1.bf16.msra.mxu0 %v754_v22 }
 0x238   :  { %v384_v26 = vpop.f32.mrb[0].mxu1 }
 0x239   :  { %v385_v27 = vadd.f32 %v384_v26, %v313_v24  ;;  %v386_v28 = vpop.f32.mrb[1].mxu1 }
 0x23a   :  { %v387_v29 = vadd.f32 %v386_v28, %v317_v25  ;;  %v521_v25 = vsub.s32 6, %v1021_v13 }
 0x23b   :  { %v389_v30 = vmax.f32 %v385_v27, 0.0 }
 0x23c   :  { %v390_v31 = vmax.f32 %v387_v29, 0.0  ;;  %v522_v26 = vrot.slane %v1024_v15, %v521_v25  ;;  %v526_v27 = vrot.slane %v1026_v16, %v521_v25 }
 0x23d   :  { %v391_v32 = vrot.slane %v389_v30, 4  ;;  %v405_v33 = vmul.f32 %v389_v30, %v389_v30 }
 0x23e   :  { %v397_v34 = vrot.slane %v390_v31, 4  ;;  %v406_v35 = vmul.f32 %v390_v31, %v390_v31 }
 0x23f   :  { %v392_v36 = vadd.f32 %v391_v32, %v389_v30  ;;  %v407_v37 = vrot.slane %v405_v33, 4 }
 0x240   :  { %v398_v38 = vadd.f32 %v397_v34, %v390_v31  ;;  %v413_v39 = vrot.slane %v406_v35, 4 }
 0x241   :  { %v393_v40 = vrot.slane %v392_v36, 2  ;;  %v408_v41 = vadd.f32 %v407_v37, %v405_v33 }
 0x242   :  { %v399_v42 = vrot.slane %v398_v38, 2  ;;  %v414_v43 = vadd.f32 %v413_v39, %v406_v35 }
 0x243   :  { %v394_v44 = vadd.f32 %v393_v40, %v392_v36  ;;  %v409_v45 = vrot.slane %v408_v41, 2 }
 0x244   :  { %v400_v46 = vadd.f32 %v399_v42, %v398_v38  ;;  %v415_v47 = vrot.slane %v414_v43, 2 }
 0x245   :  { %v395_v48 = vrot.slane %v394_v44, 1  ;;  %v410_v49 = vadd.f32 %v409_v45, %v408_v41 }
 0x246   :  { %v401_v50 = vrot.slane %v400_v46, 1  ;;  %v416_v51 = vadd.f32 %v415_v47, %v414_v43 }
 0x247   :  { %v396_v52 = vadd.f32 %v395_v48, %v394_v44  ;;  %v411_v53 = vrot.slane %v410_v49, 1 }
 0x248   :  { %v402_v54 = vadd.f32 %v401_v50, %v400_v46  ;;  %v417_v55 = vrot.slane %v416_v51, 1 }
 0x249   :  { %v403_v56 = vmul.f32 0.125, %v396_v52  ;;  %v412_v57 = vadd.f32 %v411_v53, %v410_v49 }
 0x24a   :  { %v404_v58 = vmul.f32 0.125, %v402_v54  ;;  %v418_v59 = vadd.f32 %v417_v55, %v416_v51 }
 0x24b   :  { %v419_v60 = vmul.f32 0.125, %v412_v57  ;;  %v421_v61 = vmul.f32 %v403_v56, %v403_v56  ;;  %v427_v8 = vsub.f32 %v389_v30, %v403_v56 }
 0x24c   :  { %v420_v62 = vmul.f32 0.125, %v418_v59  ;;  %v422_v63 = vmul.f32 %v404_v58, %v404_v58  ;;  %v428_v11 = vsub.f32 %v390_v31, %v404_v58 }
 0x24d   :  { %v423_v0 = vsub.f32 %v419_v60, %v421_v61 }
 0x24e   :  { %v424_v1 = vsub.f32 %v420_v62, %v422_v63 }
 0x24f   :  { %v425_v2 = vmax.f32 %v423_v0, 0.0 }
 0x250   :  { %v426_v3 = vmax.f32 %v424_v1, 0.0 }
 0x251   :  { %v429_v4 = vadd.f32 1e-05, %v425_v2 }
 0x252   :  { %v430_v5 = vadd.f32 1e-05, %v426_v3 }
 0x253   :  { %769 = vrsqrt.f32 %v429_v4 }
 0x254   :  { %771 = vrsqrt.f32 %v430_v5 }
 0x25d   :  { %v770_v10 = vpop.eup %769 }
 0x25e   :  { %v772_v14 = vpop.eup %771  ;;  %v433_v17 = vmul.f32 %v770_v10, %v427_v8 }
 0x25f   :  { %v434_v18 = vmul.f32 %v772_v14, %v428_v11 }
 0x260   :  { %v443_v20 = vmul.f32 %v438_v9, %v433_v17 }
 0x261   :  { %v444_v22 = vmul.f32 %v442_v12, %v434_v18 }
 0x262   :  { %v453_v24 = vadd.f32 %v448_v21, %v443_v20 }
 0x263   :  { %v454_v23 = vadd.f32 %v452_v19, %v444_v22 }
 0x265   :  { %591 = vmatprep.mubr.f32.mxu0 %v454_v23 }
 0x266   :  { %592 = vmatmul.mubr.f32.vlgmr.msra.gmra.mrb[2].mxu0 %v453_v24 }
 0x339   :  { %v593_v28 = vpop.f32.mrb[2].mxu0 }
 0x33a   :  { %v594_v29 = vadd.f32 %v593_v28, %v522_v26  ;;  %v595_v30 = vpop.f32.mrb[3].mxu0 }
 0x33b   :  { %v596_v31 = vadd.f32 %v595_v30, %v526_v27 }
 0x33c   :  { %v598_v32 = vmax.f32 %v594_v29, 0.0 }
 0x33d   :  { %v599_v33 = vmax.f32 %v596_v31, 0.0 }
 0x33e   :  { %600 = vst [vmem:[#allocation11] sm:$0xff] %v598_v32 }
 0x33f   :  { %601 = vst [vmem:[#allocation11 + $0x8] sm:$0xff] %v599_v33 }
 0x340   :  { %894 = shalt.err (!%p891_p2)
}
 0x341   :  { %s895_s30 = scalar_lea.hbm %s1065_s5, 256 }
 0x342   :  { %p896_p3 = scmp.ne.s32.totalorder %s1065_s5, %s895_s30  ;;  %p899_p4 = scmp.lt.u32.totalorder %s895_s30, %s1065_s5 }
 0x344   :  { %p901_p5 = pnand %p899_p4, %p896_p3 }
 0x346   :  { %904 = shalt.err (!%p901_p5)
}
 0x347   :  { %611 = dma.vmem_to_hbm [thread:$0]  %s609_s29, 256, %s1065_s5, [#allocation4]  }
 0x348   :  { %911 = dma.done.wait [#allocation4], 256  }
 0x349   :  { %912 = vsyncadd [#allocation4], 4294967040 }
 0x34a   :  { %615 = vsyncpa [#allocation3], 1 }
 0x34b   :  { %616 = vsyncpa [#allocation6], 1 }
 0x34c   :  { %617 = vsyncpa [#allocation9], 1 }
 0x34d   :  { %618 = vsyncpa [#allocation4], 1 }

</bundles_post_ra>
